<compile_context>
chip_gen: v6e
topology: v6e:2x2x1
jax: 0.10.0
libtpu: 0.0.40
codegen_flags: <defaults>
</compile_context>

<pallas_src>
import functools

import jax
import jax.numpy as jnp
from jax import lax
from jax.experimental import pallas as pl
from jax.experimental.pallas import tpu as pltpu

K = 3                      # matches `k = 3` in the PyTorch script
_INT32_MAX = 2**31 - 1     # Python int -> jaxpr literal, never a captured constant


def _local_topk_rows(d, row_ids, k):
    """k smallest of `d` (TR, TQ) along the sublane (row) axis, per lane column.

    `row_ids` is a (TR, 1) int32 column of *global* reference indices; it broadcasts
    inside the where/compare ops so no full (TR, TQ) index plane is materialized.
    Returns two length-k lists of (1, TQ) rows: values ascending, ties resolved to the
    smallest global index."""
    vals, idxs = [], []
    work = d
    for j in range(k):
        mv = jnp.min(work, axis=0, keepdims=True)                        # (1, TQ)
        tie = work == mv                                                 # (TR, TQ)
        sel = jnp.min(jnp.where(tie, row_ids, _INT32_MAX), axis=0, keepdims=True)
        vals.append(mv)
        idxs.append(sel)
        if j < k - 1:               # skip the dead masking pass on the final pick
            work = jnp.where(tie & (row_ids == sel), jnp.inf, work)
    return vals, idxs


def _merge_sorted_topk(r_v, r_i, l_v, l_i, k):
    """Merge two ascending top-k lists (length-k lists of (1, TQ) rows), keep the k
    smallest.  Pure compare/select network on tiny rows -- no sublane concatenation.
    Ties prefer the resident list `r`, whose global indices are always smaller than the
    local tile's (earlier reference tiles), preserving smallest-index tie order."""
    x_v, x_i = list(r_v), list(r_i)
    y_v, y_i = list(l_v), list(l_i)
    out_v, out_i = [], []
    for t in range(k):
        c = x_v[0] <= y_v[0]
        out_v.append(jnp.where(c, x_v[0], y_v[0]))
        out_i.append(jnp.where(c, x_i[0], y_i[0]))
        rem = k - 1 - t
        if rem == 0:
            break
        x_v = [jnp.where(c, x_v[s + 1], x_v[s]) for s in range(rem)]
        x_i = [jnp.where(c, x_i[s + 1], x_i[s]) for s in range(rem)]
        y_v = [jnp.where(c, y_v[s], y_v[s + 1]) for s in range(rem)]
        y_i = [jnp.where(c, y_i[s], y_i[s + 1]) for s in range(rem)]
    return out_v, out_i


def _knn_kernel(x_ref, y_ref, dist_ref, idx_ref, *, k, tr, rt, r_real, r_pad):
    """One (query-tile, reference-tile) step of 'k nearest reference points per query'."""
    ri = pl.program_id(2)

    x_t = x_ref[0]                                    # (C, TQ)
    y_t = y_ref[0]                                    # (C, TR)
    x32 = x_t.astype(jnp.float32)
    y32 = y_t.astype(jnp.float32)
    tq = x_t.shape[1]
    x2 = jnp.sum(x32 * x32, axis=0, keepdims=True)    # (1, TQ)
    y2 = jnp.sum(y32 * y32, axis=0, keepdims=True)    # (1, TR)

    # ||x_q - y_r||^2 = ||y_r||^2 + ||x_q||^2 - 2 y_r.x_q as a single augmented matmul:
    # the row/column broadcasts ride the MXU (which has slack) instead of the VPU.
    # HIGHEST precision keeps f32 accuracy for near-tie neighbour ordering.
    y_aug = jnp.concatenate(
        [y32 * -2.0, y2, jnp.ones((1, tr), jnp.float32)], axis=0)        # (C+2, TR)
    x_aug = jnp.concatenate(
        [x32, jnp.ones((1, tq), jnp.float32), x2], axis=0)               # (C+2, TQ)
    d = lax.dot_general(y_aug, x_aug, (((0,), (0,)), ((), ())),
                        precision=lax.Precision.HIGHEST,
                        preferred_element_type=jnp.float32)              # (TR, TQ)
    d = jnp.maximum(d, 0.0)
    # NOTE: ||a||^2 + ||b||^2 - 2 a.b can lose precision for nearly coincident points.

    # Global reference indices as a (TR, 1) column (no full index plane).
    row_ids = ri * tr + lax.broadcasted_iota(jnp.int32, (tr, 1), 0)
    if r_pad != r_real:           # trace-time switch: mask padded reference rows
        d = jnp.where(row_ids >= r_real, jnp.inf, d)

    loc_v, loc_i = _local_topk_rows(d, row_ids, k)                       # k x (1, TQ)

    def write(vals, idxs, sqrt_vals):
        for j in range(k):
            v = vals[j]
            dist_ref[0, pl.ds(j, 1), :] = jnp.sqrt(v) if sqrt_vals else v
            idx_ref[0, pl.ds(j, 1), :] = idxs[j]

    if rt == 1:
        # Single reference tile: the local result is already final.
        write(loc_v, loc_i, sqrt_vals=True)
    else:
        @pl.when(ri == 0)
        def _first():
            # First reference tile: store local top-k directly (no init-to-inf, no merge).
            write(loc_v, loc_i, sqrt_vals=False)

        @pl.when(ri > 0)
        def _merge():
            res_v = [dist_ref[0, pl.ds(j, 1), :] for j in range(k)]
            res_i = [idx_ref[0, pl.ds(j, 1), :] for j in range(k)]
            mer_v, mer_i = _merge_sorted_topk(res_v, res_i, loc_v, loc_i, k)
            last = ri == rt - 1
            for j in range(k):
                v = mer_v[j]
                # Fold the final sqrt into the last merge write (only k*TQ values).
                dist_ref[0, pl.ds(j, 1), :] = jnp.where(last, jnp.sqrt(v), v)
                idx_ref[0, pl.ds(j, 1), :] = mer_i[j]


def _vmem_capacity_bytes():
    try:
        return int(pltpu.get_tpu_info().vmem_capacity_bytes)
    except Exception:
        return 64 * 1024 * 1024          # v7x-safe conservative default


def _tile_and_pad(dim, max_tile):
    """Pick a tile (multiple of 128, or the full dim) and the padded extent."""
    assert max_tile % 128 == 0
    if dim <= max_tile:
        return dim, dim                  # full-dim block is always legal, no padding
    dim_pad = ((dim + 127) // 128) * 128
    for t in range(max_tile, 0, -128):
        if dim_pad % t == 0:
            return t, dim_pad
    return 128, dim_pad                  # unreachable: 128 always divides dim_pad


def _pad_points(x, new_n):
    n = x.shape[-1]
    if new_n == n:
        return x
    return jnp.pad(x, ((0, 0), (0, 0), (0, new_n - n)))


def _vmem_limit_bytes(C, tq, tr, k, itemsize, capacity):
    inputs = 2 * 2 * C * (tq + tr) * itemsize      # double-buffered x / y tiles
    outputs = 2 * 2 * 2 * k * tq * 4               # double-buffered dist / idx tiles
    temps = 14 * tq * tr * 4                       # distance tile + top-k temporaries
    est = inputs + outputs + temps + (8 << 20)     # headroom for Mosaic internal scratch
    cap = (capacity * 3) // 4                      # never request ~all of VMEM (v7x: 64MiB)
    return int(max(32 << 20, min(est, cap)))


def _knn_call(query, ref, k, capacity, max_query_tile, max_ref_tile):
    """k nearest `ref` points for every `query` point -> ((B,k,Q) dist, (B,k,Q) idx)."""
    B, C, Q = query.shape
    Bb, Cb, R = ref.shape
    assert B == Bb and C == Cb and R >= k and Q >= 1

    tq, q_pad = _tile_and_pad(Q, max_query_tile)
    tr, r_pad = _tile_and_pad(R, max_ref_tile)
    qt, rt = q_pad // tq, r_pad // tr

    qp = _pad_points(query, q_pad)   # zero-padded query lanes are sliced off below
    rp = _pad_points(ref, r_pad)     # padded reference rows are masked to +inf in-kernel

    kernel = functools.partial(_knn_kernel, k=k, tr=tr, rt=rt, r_real=R, r_pad=r_pad)

    dist, idx = pl.pallas_call(
        kernel,
        out_shape=(jax.ShapeDtypeStruct((B, k, q_pad), jnp.float32),
                   jax.ShapeDtypeStruct((B, k, q_pad), jnp.int32)),
        grid_spec=pltpu.PrefetchScalarGridSpec(
            num_scalar_prefetch=0,
            grid=(B, qt, rt),                      # reference (reduction) axis innermost
            in_specs=[
                pl.BlockSpec((1, C, tq), lambda b, qi, ri: (b, 0, qi)),
                pl.BlockSpec((1, C, tr), lambda b, qi, ri: (b, 0, ri)),
            ],
            out_specs=[
                pl.BlockSpec((1, k, tq), lambda b, qi, ri: (b, 0, qi)),
                pl.BlockSpec((1, k, tq), lambda b, qi, ri: (b, 0, qi)),
            ],
        ),
        compiler_params=pltpu.CompilerParams(
            dimension_semantics=("parallel", "parallel", "arbitrary"),
            vmem_limit_bytes=_vmem_limit_bytes(
                C, tq, tr, k, query.dtype.itemsize, capacity),
        ),
    )(qp, rp)

    if q_pad != Q:
        dist = dist[:, :, :Q]
        idx = idx[:, :, :Q]
    return dist, idx


def gtknn_forward(a, b, k=K, *, max_query_tile=None, max_ref_tile=None):
    """Returns (dist1.permute(0,2,1), dist2, idx1.permute(0,2,1), idx2):
    shapes (B,k,N), (B,k,M), (B,k,N), (B,k,M)."""
    capacity = _vmem_capacity_bytes()
    if max_query_tile is None or max_ref_tile is None:
        big_vmem = capacity >= (100 << 20)     # v5e / v6e: 128 MiB; v7x: 64 MiB per TC
        dq, dr = (1024, 512) if big_vmem else (512, 512)
        max_query_tile = max_query_tile or dq
        max_ref_tile = max_ref_tile or dr
    # TODO(synk): torch.topk returns int64 indices; int32 is emitted here (JAX default).
    dist1, idx1 = _knn_call(a, b, k, capacity, max_query_tile, max_ref_tile)  # (B,k,N)
    dist2, idx2 = _knn_call(b, a, k, capacity, max_query_tile, max_ref_tile)  # (B,k,M)
    return dist1, dist2, idx1, idx2


# --------------------------- pure-JAX reference & checks ---------------------------

def _reference(a, b, k):
    diff = a[:, :, :, None] - b[:, :, None, :]            # (B, C, N, M)
    compare = jnp.sqrt(jnp.sum(diff * diff, axis=1))      # (B, N, M)
    nd1, ni1 = lax.top_k(-compare, k)                     # k smallest along M
    d1 = -nd1                                             # (B, N, k)
    cT = jnp.swapaxes(compare, 1, 2)                      # (B, M, N)
    nd2, ni2 = lax.top_k(-cT, k)                          # k smallest along N
    d2 = jnp.swapaxes(-nd2, 1, 2)                         # (B, k, M)
    i2 = jnp.swapaxes(ni2, 1, 2)
    return d1.transpose(0, 2, 1), d2, ni1.transpose(0, 2, 1), i2, compare


def _check(a, b, k, outs, atol=1e-4):
    d1, d2, i1, i2 = outs
    r1, r2, _, _, compare = _reference(a, b, k)
    assert d1.shape == r1.shape and d2.shape == r2.shape
    assert jnp.allclose(d1, r1, atol=atol, rtol=1e-4), "dist1 mismatch"
    assert jnp.allclose(d2, r2, atol=atol, rtol=1e-4), "dist2 mismatch"
    # Validate indices by looking the distances back up in the exact matrix; this is
    # robust to fp near-ties (any of the tied indices is acceptable).
    g1 = jnp.take_along_axis(compare, jnp.swapaxes(i1, 1, 2), axis=2)     # (B, N, k)
    assert jnp.allclose(jnp.swapaxes(g1, 1, 2), r1, atol=atol, rtol=1e-4), "idx1 mismatch"
    g2 = jnp.take_along_axis(jnp.swapaxes(compare, 1, 2),
                             jnp.swapaxes(i2, 1, 2), axis=2)              # (B, M, k)
    assert jnp.allclose(jnp.swapaxes(g2, 1, 2), r2, atol=atol, rtol=1e-4), "idx2 mismatch"


if __name__ == "__main__":
    key = jax.random.PRNGKey(0)
    ka, kb, kc, kd = jax.random.split(key, 4)

    # Case 1: the module's nominal small shapes (single tile per axis).
    B, C, N, M = 2, 4, 16, 16
    a = jax.random.normal(ka, (B, C, N), dtype=jnp.float32)
    b = jax.random.normal(kb, (B, C, M), dtype=jnp.float32)
    outs = gtknn_forward(a, b, K)
    jax.block_until_ready(outs)
    _check(a, b, K, outs)

    # Case 2: ragged sizes with forced small tiles -- exercises the multi-tile merge
    # network, first/last-tile handling and the pad-to-128 + in-kernel masking path.
    B2, C2, N2, M2 = 2, 4, 200, 176
    a2 = jax.random.normal(kc, (B2, C2, N2), dtype=jnp.float32)
    b2 = jax.random.normal(kd, (B2, C2, M2), dtype=jnp.float32)
    outs2 = gtknn_forward(a2, b2, K, max_query_tile=128, max_ref_tile=128)
    jax.block_until_ready(outs2)
    _check(a2, b2, K, outs2)

    print("KERNEL_OK")
</pallas_src>

<mosaic_0001>
module attributes {stable_mosaic.version = 11 : i64} {
  func.func @_knn_kernel(%arg0: i32, %arg1: i32, %arg2: i32, %arg3: memref<1x4x16xf32, #tpu.memory_space<vmem>>, %arg4: memref<1x4x16xf32, #tpu.memory_space<vmem>>, %arg5: memref<1x3x16xf32, #tpu.memory_space<vmem>>, %arg6: memref<1x3x16xi32, #tpu.memory_space<vmem>>) attributes {dimension_semantics = [#tpu.dimension_semantics<parallel>, #tpu.dimension_semantics<parallel>, #tpu.dimension_semantics<arbitrary>], iteration_bounds = array<i64: 2, 1, 1>, scalar_prefetch = 0 : i64, scratch_operands = 0 : i64, tpu.core_type = #tpu.core_type<tc>, window_params = [{transform_indices = @transform_0, window_bounds = array<i64: 1, 4, 16>}, {transform_indices = @transform_1, window_bounds = array<i64: 1, 4, 16>}, {transform_indices = @transform_2, window_bounds = array<i64: 1, 3, 16>}, {transform_indices = @transform_3, window_bounds = array<i64: 1, 3, 16>}]} {
    %c0 = arith.constant 0 : index
    %c0_0 = arith.constant 0 : index
    %c0_1 = arith.constant 0 : index
    %0 = vector.load %arg3[%c0, %c0_0, %c0_1] : memref<1x4x16xf32, #tpu.memory_space<vmem>>, vector<1x4x16xf32>
    %1 = vector.shape_cast %0 : vector<1x4x16xf32> to vector<4x16xf32>
    %c0_2 = arith.constant 0 : index
    %c0_3 = arith.constant 0 : index
    %c0_4 = arith.constant 0 : index
    %2 = vector.load %arg4[%c0_2, %c0_3, %c0_4] : memref<1x4x16xf32, #tpu.memory_space<vmem>>, vector<1x4x16xf32>
    %3 = vector.shape_cast %2 : vector<1x4x16xf32> to vector<4x16xf32>
    %4 = arith.mulf %1, %1 : vector<4x16xf32>
    %cst = arith.constant dense<0.000000e+00> : vector<16xf32>
    %5 = vector.multi_reduction <add>, %4, %cst [0] : vector<4x16xf32> to vector<16xf32>
    %6 = vector.shape_cast %5 : vector<16xf32> to vector<1x16xf32>
    %7 = arith.mulf %3, %3 : vector<4x16xf32>
    %cst_5 = arith.constant dense<0.000000e+00> : vector<16xf32>
    %8 = vector.multi_reduction <add>, %7, %cst_5 [0] : vector<4x16xf32> to vector<16xf32>
    %9 = vector.shape_cast %8 : vector<16xf32> to vector<1x16xf32>
    %cst_6 = arith.constant -2.000000e+00 : f32
    %10 = vector.broadcast %cst_6 : f32 to vector<4x16xf32>
    %11 = arith.mulf %3, %10 : vector<4x16xf32>
    %cst_7 = arith.constant 1.000000e+00 : f32
    %12 = vector.broadcast %cst_7 : f32 to vector<1x16xf32>
    %13 = tpu.concatenate %11, %9, %12 in 0 : vector<4x16xf32>, vector<1x16xf32>, vector<1x16xf32> -> vector<6x16xf32>
    %cst_8 = arith.constant 1.000000e+00 : f32
    %14 = vector.broadcast %cst_8 : f32 to vector<1x16xf32>
    %15 = tpu.concatenate %1, %14, %6 in 0 : vector<4x16xf32>, vector<1x16xf32>, vector<1x16xf32> -> vector<6x16xf32>
    %cst_9 = arith.constant dense<0.000000e+00> : vector<16x16xf32>
    %16 = tpu.matmul %13, %15, %cst_9 {dimension_numbers = #tpu.dot_dimension_numbers<[0], [0], [1], [1], [0, 1, 1, 1], [], []>, precision = #tpu.contract_precision<fp32>} : vector<6x16xf32>, vector<6x16xf32>, vector<16x16xf32> -> vector<16x16xf32>
    %cst_10 = arith.constant 0.000000e+00 : f32
    %17 = vector.broadcast %cst_10 : f32 to vector<16x16xf32>
    %18 = arith.maximumf %16, %17 : vector<16x16xf32>
    %c16_i32 = arith.constant 16 : i32
    %19 = arith.muli %arg2, %c16_i32 : i32
    %20 = tpu.iota {dimensions = array<i32: 0>} : vector<16x1xi32>
    %21 = vector.broadcast %19 : i32 to vector<16x1xi32>
    %22 = arith.addi %21, %20 : vector<16x1xi32>
    %cst_11 = arith.constant dense<0x7F800000> : vector<16xf32>
    %23 = vector.multi_reduction <minimumf>, %18, %cst_11 [0] : vector<16x16xf32> to vector<16xf32>
    %24 = vector.shape_cast %23 : vector<16xf32> to vector<1x16xf32>
    %25 = vector.broadcast %24 : vector<1x16xf32> to vector<16x16xf32>
    %26 = arith.cmpf oeq, %18, %25 : vector<16x16xf32>
    %c2147483647_i32 = arith.constant 2147483647 : i32
    %27 = vector.shape_cast %22 : vector<16x1xi32> to vector<16x1xi32>
    %28 = vector.broadcast %27 : vector<16x1xi32> to vector<16x16xi32>
    %29 = vector.broadcast %c2147483647_i32 : i32 to vector<16x16xi32>
    %30 = arith.select %26, %28, %29 : vector<16x16xi1>, vector<16x16xi32>
    %cst_12 = arith.constant dense<2147483647> : vector<16xi32>
    %31 = vector.multi_reduction <minsi>, %30, %cst_12 [0] : vector<16x16xi32> to vector<16xi32>
    %32 = vector.shape_cast %31 : vector<16xi32> to vector<1x16xi32>
    %33 = vector.broadcast %22 : vector<16x1xi32> to vector<16x16xi32>
    %34 = vector.broadcast %32 : vector<1x16xi32> to vector<16x16xi32>
    %35 = arith.cmpi eq, %33, %34 : vector<16x16xi32>
    %36 = arith.andi %26, %35 : vector<16x16xi1>
    %cst_13 = arith.constant 0x7F800000 : f32
    %37 = vector.broadcast %cst_13 : f32 to vector<16x16xf32>
    %38 = arith.select %36, %37, %18 : vector<16x16xi1>, vector<16x16xf32>
    %cst_14 = arith.constant dense<0x7F800000> : vector<16xf32>
    %39 = vector.multi_reduction <minimumf>, %38, %cst_14 [0] : vector<16x16xf32> to vector<16xf32>
    %40 = vector.shape_cast %39 : vector<16xf32> to vector<1x16xf32>
    %41 = vector.broadcast %40 : vector<1x16xf32> to vector<16x16xf32>
    %42 = arith.cmpf oeq, %38, %41 : vector<16x16xf32>
    %c2147483647_i32_15 = arith.constant 2147483647 : i32
    %43 = vector.shape_cast %22 : vector<16x1xi32> to vector<16x1xi32>
    %44 = vector.broadcast %43 : vector<16x1xi32> to vector<16x16xi32>
    %45 = vector.broadcast %c2147483647_i32_15 : i32 to vector<16x16xi32>
    %46 = arith.select %42, %44, %45 : vector<16x16xi1>, vector<16x16xi32>
    %cst_16 = arith.constant dense<2147483647> : vector<16xi32>
    %47 = vector.multi_reduction <minsi>, %46, %cst_16 [0] : vector<16x16xi32> to vector<16xi32>
    %48 = vector.shape_cast %47 : vector<16xi32> to vector<1x16xi32>
    %49 = vector.broadcast %22 : vector<16x1xi32> to vector<16x16xi32>
    %50 = vector.broadcast %48 : vector<1x16xi32> to vector<16x16xi32>
    %51 = arith.cmpi eq, %49, %50 : vector<16x16xi32>
    %52 = arith.andi %42, %51 : vector<16x16xi1>
    %cst_17 = arith.constant 0x7F800000 : f32
    %53 = vector.broadcast %cst_17 : f32 to vector<16x16xf32>
    %54 = arith.select %52, %53, %38 : vector<16x16xi1>, vector<16x16xf32>
    %cst_18 = arith.constant dense<0x7F800000> : vector<16xf32>
    %55 = vector.multi_reduction <minimumf>, %54, %cst_18 [0] : vector<16x16xf32> to vector<16xf32>
    %56 = vector.shape_cast %55 : vector<16xf32> to vector<1x16xf32>
    %57 = vector.broadcast %56 : vector<1x16xf32> to vector<16x16xf32>
    %58 = arith.cmpf oeq, %54, %57 : vector<16x16xf32>
    %c2147483647_i32_19 = arith.constant 2147483647 : i32
    %59 = vector.shape_cast %22 : vector<16x1xi32> to vector<16x1xi32>
    %60 = vector.broadcast %59 : vector<16x1xi32> to vector<16x16xi32>
    %61 = vector.broadcast %c2147483647_i32_19 : i32 to vector<16x16xi32>
    %62 = arith.select %58, %60, %61 : vector<16x16xi1>, vector<16x16xi32>
    %cst_20 = arith.constant dense<2147483647> : vector<16xi32>
    %63 = vector.multi_reduction <minsi>, %62, %cst_20 [0] : vector<16x16xi32> to vector<16xi32>
    %64 = vector.shape_cast %63 : vector<16xi32> to vector<1x16xi32>
    %65 = math.sqrt %24 : vector<1x16xf32>
    %c0_21 = arith.constant 0 : index
    %c0_22 = arith.constant 0 : index
    %c0_23 = arith.constant 0 : index
    %66 = vector.load %arg5[%c0_21, %c0_22, %c0_23] : memref<1x3x16xf32, #tpu.memory_space<vmem>>, vector<1x1x16xf32>
    %67 = vector.shape_cast %66 : vector<1x1x16xf32> to vector<1x16xf32>
    %68 = vector.shape_cast %65 : vector<1x16xf32> to vector<1x1x16xf32>
    tpu.vector_store %arg5[%c0_21, %c0_22, %c0_23], %68 {strides = array<i32>} : memref<1x3x16xf32, #tpu.memory_space<vmem>>, vector<1x1x16xf32>,
    %c0_24 = arith.constant 0 : index
    %c0_25 = arith.constant 0 : index
    %c0_26 = arith.constant 0 : index
    %69 = vector.load %arg6[%c0_24, %c0_25, %c0_26] : memref<1x3x16xi32, #tpu.memory_space<vmem>>, vector<1x1x16xi32>
    %70 = vector.shape_cast %69 : vector<1x1x16xi32> to vector<1x16xi32>
    %71 = vector.shape_cast %32 : vector<1x16xi32> to vector<1x1x16xi32>
    tpu.vector_store %arg6[%c0_24, %c0_25, %c0_26], %71 {strides = array<i32>} : memref<1x3x16xi32, #tpu.memory_space<vmem>>, vector<1x1x16xi32>,
    %72 = math.sqrt %40 : vector<1x16xf32>
    %c0_27 = arith.constant 0 : index
    %c1 = arith.constant 1 : index
    %c0_28 = arith.constant 0 : index
    %73 = vector.load %arg5[%c0_27, %c1, %c0_28] : memref<1x3x16xf32, #tpu.memory_space<vmem>>, vector<1x1x16xf32>
    %74 = vector.shape_cast %73 : vector<1x1x16xf32> to vector<1x16xf32>
    %75 = vector.shape_cast %72 : vector<1x16xf32> to vector<1x1x16xf32>
    tpu.vector_store %arg5[%c0_27, %c1, %c0_28], %75 {strides = array<i32>} : memref<1x3x16xf32, #tpu.memory_space<vmem>>, vector<1x1x16xf32>,
    %c0_29 = arith.constant 0 : index
    %c1_30 = arith.constant 1 : index
    %c0_31 = arith.constant 0 : index
    %76 = vector.load %arg6[%c0_29, %c1_30, %c0_31] : memref<1x3x16xi32, #tpu.memory_space<vmem>>, vector<1x1x16xi32>
    %77 = vector.shape_cast %76 : vector<1x1x16xi32> to vector<1x16xi32>
    %78 = vector.shape_cast %48 : vector<1x16xi32> to vector<1x1x16xi32>
    tpu.vector_store %arg6[%c0_29, %c1_30, %c0_31], %78 {strides = array<i32>} : memref<1x3x16xi32, #tpu.memory_space<vmem>>, vector<1x1x16xi32>,
    %79 = math.sqrt %56 : vector<1x16xf32>
    %c0_32 = arith.constant 0 : index
    %c2 = arith.constant 2 : index
    %c0_33 = arith.constant 0 : index
    %80 = vector.load %arg5[%c0_32, %c2, %c0_33] : memref<1x3x16xf32, #tpu.memory_space<vmem>>, vector<1x1x16xf32>
    %81 = vector.shape_cast %80 : vector<1x1x16xf32> to vector<1x16xf32>
    %82 = vector.shape_cast %79 : vector<1x16xf32> to vector<1x1x16xf32>
    tpu.vector_store %arg5[%c0_32, %c2, %c0_33], %82 {strides = array<i32>} : memref<1x3x16xf32, #tpu.memory_space<vmem>>, vector<1x1x16xf32>,
    %c0_34 = arith.constant 0 : index
    %c2_35 = arith.constant 2 : index
    %c0_36 = arith.constant 0 : index
    %83 = vector.load %arg6[%c0_34, %c2_35, %c0_36] : memref<1x3x16xi32, #tpu.memory_space<vmem>>, vector<1x1x16xi32>
    %84 = vector.shape_cast %83 : vector<1x1x16xi32> to vector<1x16xi32>
    %85 = vector.shape_cast %64 : vector<1x16xi32> to vector<1x1x16xi32>
    tpu.vector_store %arg6[%c0_34, %c2_35, %c0_36], %85 {strides = array<i32>} : memref<1x3x16xi32, #tpu.memory_space<vmem>>, vector<1x1x16xi32>,
    return
  }
  func.func @transform_0(%arg0: i32, %arg1: i32, %arg2: i32) -> (i32, i32, i32) {
    %c0_i32 = arith.constant 0 : i32
    %c0_i32_0 = arith.constant 0 : i32
    return %arg0, %c0_i32, %arg1 : i32, i32, i32
  }
  func.func @transform_1(%arg0: i32, %arg1: i32, %arg2: i32) -> (i32, i32, i32) {
    %c0_i32 = arith.constant 0 : i32
    %c0_i32_0 = arith.constant 0 : i32
    return %arg0, %c0_i32, %arg2 : i32, i32, i32
  }
  func.func @transform_2(%arg0: i32, %arg1: i32, %arg2: i32) -> (i32, i32, i32) {
    %c0_i32 = arith.constant 0 : i32
    %c0_i32_0 = arith.constant 0 : i32
    return %arg0, %c0_i32, %arg1 : i32, i32, i32
  }
  func.func @transform_3(%arg0: i32, %arg1: i32, %arg2: i32) -> (i32, i32, i32) {
    %c0_i32 = arith.constant 0 : i32
    %c0_i32_0 = arith.constant 0 : i32
    return %arg0, %c0_i32, %arg1 : i32, i32, i32
  }
}

</mosaic_0001>

<bundles_post_ra>
// kernel: tpu_custom_call.1
= control target key start
LH: loop header
LB: loop body
LE: loop exit
PB: predicated region body
PF: predicated region fallthrough
CT: control target
= control target key end

     0   :  { %9 = vsyncpa [#allocation3], 0  ;;  %s1557_s0 = inlined_call_operand.hbm [shape: f32[2,4,16], index: 0, kind: input, shape index: {}]   ;;  %s1558_s1 = inlined_call_operand.hbm [shape: f32[2,4,16], index: 1, kind: input, shape index: {}]   ;;  %s1559_s2 = inlined_call_operand.vmem [shape: f32[2,3,16], index: 2, kind: output, shape index: {0}]   ;;  %s1560_s3 = inlined_call_operand.vmem [shape: s32[2,3,16], index: 3, kind: output, shape index: {1}]  }
   0x1   :  { %11 = vsyncpa [#allocation3 + $0x1], 0 }
   0x2   :  { %12 = vsyncpa [#allocation5], 0 }
   0x3   :  { %14 = vsyncpa [#allocation5 + $0x1], 0  ;;  %s1377_s12 = smov 0   ;;  %s1379_s13 = smov 0  }
   0x4   :  { %s1381_s14 = smov 0   ;;  %s1383_s15 = smov 0  }
   0x5   :  { %s1385_s16 = smov 0   ;;  %s1387_s17 = smov 0  }
   0x6 LB: > { %s1113_s18 = sadd.s32 4294967295, %s1353_s17   ;;  %s39_s19 = sadd.s32 1, %s1349_s16  ;;  %s1353_s17 = sphi %s1387_s17, %s20_s17   ;;  %s1349_s16 = sphi %s1385_s16, %s1569_s16   ;;  %s1345_s15 = sphi %s1383_s15, %s1568_s15   ;;  %s1341_s14 = sphi %s1381_s14, %s1567_s14   ;;  %s1337_s13 = sphi %s1379_s13, %s1566_s13   ;;  %s1333_s12 = sphi %s1377_s12, %s1565_s12  }
   0x7   : > { %p41_p0 = scmp.ge.s32.totalorder %s39_s19, 2  ;;  %s48_s20 = sadd.s32 1, %s1341_s14 }
   0x8   : > { %p55_p1 = scmp.ne.s32.totalorder %s1341_s14, %s1337_s13  ;;  %p56_p2 = scmp.eq.s32.totalorder %s1353_s17, 0 }
   0x9   : > { %s1571_s19 = smov (%p41_p0, %s39_s19), 0  ;;  %p61_p4 = scmp.ne.s32.totalorder %s1337_s13, %s1333_s12 }
   0xa   : > { %p1413_p3 = por %p56_p2, %p55_p1  ;;  %s43_s22 = ssub.s32 %s1349_s16, %s1571_s19 }
   0xb   : > { %p62_p5 = scmp.eq.s32.totalorder %s1113_s18, 0  ;;  %p46_p6 = scmp.eq.s32.totalorder %s43_s22, 0 }
   0xc   : > { %p1187_p8 = scmp.lt.s32.totalorder %s1353_s17, 2  ;;  %s1429_s25 = sand.u32 1, %s1341_s14  }
   0xd   : > { %p1420_p7 = por %p62_p5, %p61_p4  ;;  %s1118_s26 = sshll.u32 %s1349_s16, 6 }
   0xe   : > { %s1426_s24 = scalar_select %p46_p6, %s1341_s14, %s48_s20  }
   0xf   : > { %s1117_s27 = sshll.u32 %s1429_s25, 2  ;;  %s179_s30 = scalar_lea.hbm %s1557_s0, %s1118_s26 }
  0x10   : > { %s173_s4 = scalar_lea.vmem [#allocation2], %s1117_s27  ;;  %p1438_p9 = pnand %p1187_p8, %p1413_p3 }
  0x11   : > { %s181_s5 = sshll.u32 %s173_s4, 4  ;;  %p1121_p10 = scmp.ge.s32.totalorder %s1353_s17, 1  ;;  %s182_s5 = int_to_ptr.vmem [resolvable:$true] %s181_s5 }
  0x12   : > { %p205_p11 = scmp.lt.s32.totalorder %s1353_s17, 3  ;;  %s170_s7 = scalar_lea.sflag [#allocation3], %s1429_s25 }
  0x13   : > { %p1245_p12 = pneg %p1438_p9  ;;  %s1256_s8 = scalar_lea.vmem %s182_s5, 64 }
  0x14   : > { %p1257_p13 = scmp.ne.s32.totalorder %s182_s5, %s1256_s8  ;;  %s1355_s9 = smov [#allocation2]  }
  0x15   : > { %s1261_s10 = sshll.u32 %s1355_s9, 4  ;;  %s1262_s10 = int_to_ptr.vmem [resolvable:$false] %s1261_s10 }
  0x16   : > { %p1259_p0 = pnand %p1257_p13, %p1245_p12  ;;  %s1263_s11 = scalar_lea.vmem %s1262_s10, 128 }
  0x17   : > { %p1264_p2 = scmp.lt.s32.totalorder %s182_s5, %s1262_s10  ;;  %p1265_p3 = scmp.lt.s32.totalorder %s1263_s11, %s1256_s8 }
  0x18   : > { %p1260_p1 = pneg %p1259_p0 }
  0x19   : > { %p1266_p4 = por %p1265_p3, %p1264_p2 }
  0x1b   : > { %p1267_p5 = pnand %p1266_p4, %p1260_p1 }
  0x1d   : > { %1270 = shalt.err (!%p1267_p5)
}
  0x1e   : > { %1183 = dma.hbm_to_vmem [thread:$0]  (!%p1438_p9), %s179_s30, 64, %s182_s5, %s170_s7  }
  0x1f   : > { %p1456_p6 = pnand %p1121_p10, %p205_p11  ;;  %s198_s21 = scalar_lea.hbm %s1558_s1, %s1118_s26 }
  0x20   : > { %s192_s22 = scalar_lea.vmem [#allocation4], %s1117_s27  ;;  %s189_s29 = scalar_lea.sflag [#allocation5], %s1429_s25 }
  0x21   : > { %s200_s28 = sshll.u32 %s192_s22, 4  ;;  %s1356_s30 = smov [#allocation4]   ;;  %s201_s28 = int_to_ptr.vmem [resolvable:$true] %s200_s28 }
  0x22   : > { %s1284_s4 = scalar_lea.vmem %s201_s28, 64  ;;  %s1289_s5 = sshll.u32 %s1356_s30, 4  ;;  %s1290_s5 = int_to_ptr.vmem [resolvable:$false] %s1289_s5 }
  0x23   : > { %p1285_p8 = scmp.ne.s32.totalorder %s201_s28, %s1284_s4  ;;  %s1291_s7 = scalar_lea.vmem %s1290_s5, 128 }
  0x24   : > { %p1292_p10 = scmp.lt.s32.totalorder %s201_s28, %s1290_s5  ;;  %p1293_p11 = scmp.lt.s32.totalorder %s1291_s7, %s1284_s4 }
  0x25   : > { %p1287_p13 = pnand %p1285_p8, %p1245_p12 }
  0x26   : > { %p1294_p1 = por %p1293_p11, %p1292_p10 }
  0x27   : > { %p1288_p0 = pneg %p1287_p13 }
  0x29   : > { %p1295_p2 = pnand %p1294_p1, %p1288_p0 }
  0x2b   : > { %1298 = shalt.err (!%p1295_p2)
}
  0x2c   : > { %1186 = dma.hbm_to_vmem [thread:$0]  (!%p1438_p9), %s198_s21, 64, %s201_s28, %s189_s29  }
  0x2d   : > { %209 = sbr.rel (%p1456_p6) target bundleno = 526 (0x20e), region = 28  ;;  %s211_s25 = sand.u32 (!%p1456_p6), 1, %s1337_s13  }
  0x2e   : > { %s1122_s26 = sshll.u32 (!%p1456_p6), %s211_s25, 2  ;;  %s212_s27 = scalar_lea.sflag (!%p1456_p6), [#allocation3], %s211_s25 }
  0x2f   : > { %s215_s8 = scalar_lea.vmem (!%p1456_p6), [#allocation2], %s1122_s26 }
  0x32   : > { %1324 = dma.done.wait (%p1420_p7), %s212_s27, 64  }
  0x33   : > { %1326 = vsyncadd (%p1420_p7), %s212_s27, 4294967232  ;;  %s221_s9 = scalar_lea.sflag [#allocation5], %s211_s25  ;;  %s224_s10 = scalar_lea.vmem [#allocation4], %s1122_s26 }
  0x34   : > { %1328 = dma.done.wait (%p1420_p7), %s221_s9, 64  }
  0x35   : > { %1330 = vsyncadd (%p1420_p7), %s221_s9, 4294967232  ;;  %v276_v0 = vld [vmem:[%s224_s10] sm:$0xf]  ;;  %vm278_vm0 = vcmask 125952   ;;  %v275_v1 = vld [vmem:[%s215_s8] sm:$0xf] }
  0x36   : > { %v286_v2 = vmul.f32 %v276_v0, %v276_v0  ;;  %v277_v3 = vmul.f32 %v275_v1, %v275_v1  ;;  %v294_v15 = vmul.f32 -2.0, %v276_v0  ;;  %vm295_vm1 = vcmask 1043456   ;;  %p261_p7 = scmp.lt.s32.totalorder %s1345_s15, 1 }
  0x37   : > { %v299_v17 = vsel %vm295_vm1, %v275_v1, 1.0  ;;  %vm297_vm2 = vcmask 1044480   ;;  %vm340_vm3 = vcmask 1045504   ;;  %vm333_vm4 = vcmask 48128  }
  0x38   : > { %v287_v4 = vsel %vm278_vm0, %v286_v2, 0.0  ;;  %v279_v5 = vsel %vm278_vm0, %v277_v3, 0.0  ;;  %vm842_vm5 = vcmask 130048   ;;  %s1573_s15 = smov (!%p261_p7, %s1345_s15), 1  ;;  %vm940_vm11 = vcmask 122880  }
  0x39   : > { %v288_v6 = vrot.slane %v287_v4, 4  ;;  %v280_v7 = vrot.slane %v279_v5, 4  ;;  %s1124_s23 = sshll.u32 %s1573_s15, 2 }
  0x3a   : > { %s1498_s12 = scalar_lea.vmem %s1560_s3, %s1124_s23  ;;  %s1503_s21 = scalar_lea.vmem %s1559_s2, %s1124_s23 }
  0x3b   : > { %v289_v8 = vadd.f32 %v288_v6, %v287_v4  ;;  %v281_v9 = vadd.f32 %v280_v7, %v279_v5  ;;  %v836_v7 = vlaneseq }
  0x3d   : > { %v290_v10 = vrot.slane %v289_v8, 2  ;;  %v282_v11 = vrot.slane %v281_v9, 2 }
  0x3f   : > { %v291_v12 = vadd.f32 %v290_v10, %v289_v8  ;;  %v283_v13 = vadd.f32 %v282_v11, %v281_v9  ;;  %v1482_v10 = vshrl.u32 %v836_v7, 7 }
  0x41   : > { %v292_v14 = vrot.slane %v291_v12, 1  ;;  %v284_v16 = vrot.slane %v283_v13, 1 }
  0x43   : > { %v293_v18 = vadd.f32 %v292_v14, %v291_v12  ;;  %v285_v19 = vadd.f32 %v284_v16, %v283_v13  ;;  %v1485_v13 = vadd.s32 8, %v1482_v10 }
  0x45   : > { %v296_v20 = vsel %vm295_vm1, %v294_v15, %v293_v18  ;;  %v300_v21 = vsel %vm297_vm2, %v299_v17, %v285_v19 }
  0x46   : > { %v298_v22 = vsel %vm297_vm2, %v296_v20, 1.0  ;;  %v342_v23 = vsel %vm340_vm3, %v300_v21, 0 }
  0x47   : > { %301 = vxpose.xlu0.b32.start.end [1/1] (short) (narrow) %v298_v22, 16  ;;  %v375_v24 = vand.u32 4294901760, %v342_v23 }
  0x49   : > { %v462_v25 = vsub.f32 %v342_v23, %v375_v24  ;;  %1146 = vmatprep.subr.mxu0 %v375_v24 }
  0x4a   : > { %1147 = vmatpush3.msra.mxu0 %v375_v24 }
  0x4b   : > { %v463_v26 = vand.u32 4294901760, %v462_v25  ;;  %1156 = vmatprep.subr.mxu0 %v462_v25 }
  0x4d   : > { %v464_v27 = vsub.f32 %v462_v25, %v463_v26 }
  0x4f   : > { %v465_v28 = vand.u32 4294901760, %v464_v27 }
  0x51   : > { %1151 = vmatprep.subr.mxu1 %v465_v28 }
  0x52   : > { %1152 = vmatpush3.msra.mxu1 %v465_v28 }
  0x53   : > { %1161 = vmatprep.subr.mxu1 %v375_v24 }
  0xc3   : > { %v317_v29 = vpop.trf.xlu0 }
  0xc4   : > { %v335_v30 = vsel %vm333_vm4, %v317_v29, 0 }
  0xc5   : > { %v410_v31 = vand.u32 4294901760, %v335_v30 }
  0xc7   : > { %v411_v32 = vsub.f32 %v335_v30, %v410_v31  ;;  %1153 = vmatprep.mubr.f32.mxu1 %v410_v31  ;;  %v318_v33 = vpop.trf.xlu0 }
  0xc8   : > { %v338_v34 = vsel %vm333_vm4, %v318_v33, 0 }
  0xc9   : > { %v420_v35 = vand.u32 4294901760, %v338_v34  ;;  %v412_v36 = vand.u32 4294901760, %v411_v32 }
  0xcb   : > { %v421_v37 = vsub.f32 %v338_v34, %v420_v35  ;;  %1154 = vmatmul.mubr.f32.vlgmr.msra.gmra.mxu1 %v420_v35  ;;  %v413_v38 = vsub.f32 %v411_v32, %v412_v36 }
  0xcc   : > { %1163 = vmatprep.mubr.f32.mxu1 %v412_v36  ;;  %1162 = vmatpush3.msra.mxu1 %v375_v24 }
  0xcd   : > { %v422_v39 = vand.u32 4294901760, %v421_v37  ;;  %v414_v40 = vand.u32 4294901760, %v413_v38  ;;  %1171 = vmatprep.subr.mxu1 %v375_v24 }
  0xcf   : > { %1148 = vmatprep.mubr.f32.mxu0 %v414_v40  ;;  %1164 = vmatmul.mubr.f32.vlgmr.msra.gmra.mxu1 %v422_v39  ;;  %v423_v41 = vsub.f32 %v421_v37, %v422_v39 }
  0xd0   : > { %1173 = vmatprep.mubr.f32.mxu1 %v410_v31  ;;  %1172 = vmatpush3.msra.mxu1 %v375_v24 }
  0xd1   : > { %v424_v42 = vand.u32 4294901760, %v423_v41 }
  0xd3   : > { %1149 = vmatmul.mubr.f32.vlgmr.msra.gmra.mxu0 %v424_v42  ;;  %1174 = vmatmul.mubr.f32.vlgmr.msra.gmra.mxu1 %v420_v35 }
  0xd4   : > { %1157 = vmatpush3.msra.mxu0 %v462_v25  ;;  %1158 = vmatprep.mubr.f32.mxu0 %v411_v32 }
  0xd5   : > { %1166 = vmatprep.subr.mxu0 %v463_v26 }
  0xd7   : > { %1159 = vmatmul.mubr.f32.vlgmr.msra.gmra.mxu0 %v421_v37 }
  0xd8   : > { %1167 = vmatpush3.msra.mxu0 %v463_v26  ;;  %1168 = vmatprep.mubr.f32.mxu0 %v410_v31 }
  0xdb   : > { %1169 = vmatmul.mubr.f32.vlgmr.msra.gmra.mxu0 %v420_v35 }
 0x18b   : > { %v1155_v43 = vpop.f32.mrf.mxu1 }
 0x18d   : > { %v502_v44 = vpop.f32.mrf.mxu1 }
 0x18f   : > { %v1165_v45 = vpop.f32.mrf.mxu1 }
 0x191   : > { %v663_v49 = vpop.f32.mrf.mxu1 }
 0x193   : > { %v1150_v46 = vpop.f32.mrf.mxu0  ;;  %v1175_v56 = vpop.f32.mrf.mxu1 }
 0x194   : > { %v509_v48 = vadd.f32 %v1155_v43, %v1150_v46 }
 0x195   : > { %v416_v47 = vpop.f32.mrf.mxu0  ;;  %v823_v63 = vpop.f32.mrf.mxu1 }
 0x196   : > { %v503_v51 = vadd.f32 %v502_v44, %v416_v47 }
 0x197   : > { %v1160_v50 = vpop.f32.mrf.mxu0 }
 0x198   : > { %v590_v52 = vadd.f32 %v1160_v50, %v509_v48 }
 0x199   : > { %v582_v53 = vpop.f32.mrf.mxu0 }
 0x19a   : > { %v583_v54 = vadd.f32 %v582_v53, %v503_v51  ;;  %v672_v55 = vadd.f32 %v1165_v45, %v590_v52 }
 0x19b   : > { %v1170_v57 = vpop.f32.mrf.mxu0 }
 0x19c   : > { %v752_v58 = vadd.f32 %v1170_v57, %v672_v55  ;;  %v664_v59 = vadd.f32 %v663_v49, %v583_v54 }
 0x19d   : > { %v745_v60 = vpop.f32.mrf.mxu0 }
 0x19e   : > { %v830_v61 = vadd.f32 %v1175_v56, %v752_v58  ;;  %v746_v62 = vadd.f32 %v745_v60, %v664_v59 }
 0x1a0   : > { %v834_v0 = vmax.f32 %v830_v61, 0.0  ;;  %v824_v1 = vadd.f32 %v823_v63, %v746_v62 }
 0x1a2   : > { %v833_v2 = vmax.f32 %v824_v1, 0.0  ;;  %v844_v3 = vsel %vm842_vm5, %v834_v0, inf }
 0x1a4   : > { %v843_v4 = vsel %vm842_vm5, %v833_v2, inf }
 0x1a5   : > { %v845_v5 = vmin.f32 %v843_v4, %v844_v3 }
 0x1a7   : > { %v846_v6 = vrot.slane %v845_v5, 4 }
 0x1a9   : > { %v847_v8 = vmin.f32 %v845_v5, %v846_v6 }
 0x1ab   : > { %v848_v9 = vrot.slane %v847_v8, 2 }
 0x1ad   : > { %v849_v11 = vmin.f32 %v847_v8, %v848_v9 }
 0x1af   : > { %v850_v12 = vrot.slane %v849_v11, 1 }
 0x1b1   : > { %v851_v14 = vmin.f32 %v849_v11, %v850_v12 }
 0x1b3   : > { %vm852_vm6 = vcmp.eq.f32.partialorder %v833_v2, %v851_v14  ;;  %vm853_vm7 = vcmp.eq.f32.partialorder %v834_v0, %v851_v14  ;;  %1237 = vrsqrt.f32 %v851_v14  ;;  %vm935_vm13 = vcmp.eq.f32.partialorder %v851_v14, inf }
 0x1b4   : > { %v854_v15 = vsel %vm852_vm6, %v1482_v10, 2147483647  ;;  %v855_v16 = vsel %vm853_vm7, %v1485_v13, 2147483647  ;;  %v938_v27 = vand.u32 2147483648, %v851_v14  ;;  %vm937_vm14 = vcmp.eq.f32.partialorder %v851_v14, 0.0 }
 0x1b5   : > { %v856_v17 = vsel %vm842_vm5, %v854_v15, 2147483647  ;;  %v857_v18 = vsel %vm842_vm5, %v855_v16, 2147483647 }
 0x1b6   : > { %vm858_vm8 = vcmp.lt.s32.totalorder %v856_v17, %v857_v18 }
 0x1b7   : > { %v859_v19 = vsel %vm858_vm8, %v856_v17, %v857_v18 }
 0x1b8   : > { %v860_v20 = vrot.slane %v859_v19, 4 }
 0x1ba   : > { %vm861_vm9 = vcmp.lt.s32.totalorder %v859_v19, %v860_v20 }
 0x1bb   : > { %v862_v21 = vsel %vm861_vm9, %v859_v19, %v860_v20 }
 0x1bc   : > { %v863_v22 = vrot.slane %v862_v21, 2 }
 0x1be   : > { %vm864_vm10 = vcmp.lt.s32.totalorder %v862_v21, %v863_v22 }
 0x1bf   : > { %v865_v23 = vsel %vm864_vm10, %v862_v21, %v863_v22 }
 0x1c0   : > { %v1238_v24 = vpop.eup %1237  ;;  %v866_v25 = vrot.slane %v865_v23, 1 }
 0x1c1   : > { %v934_v26 = vmul.f32 %v1238_v24, %v851_v14 }
 0x1c2   : > { %vm867_vm12 = vcmp.lt.s32.totalorder %v865_v23, %v866_v25 }
 0x1c3   : > { %v868_v28 = vsel %vm867_vm12, %v865_v23, %v866_v25  ;;  %v936_v29 = vsel %vm935_vm13, %v851_v14, %v934_v26 }
 0x1c4   : > { %vm869_vm15 = vcmp.eq.s32.totalorder %v1482_v10, %v868_v28  ;;  %vm870_vm0 = vcmp.eq.s32.totalorder %v1485_v13, %v868_v28  ;;  %v939_v30 = vsel %vm937_vm14, %v938_v27, %v936_v29  ;;  %942 = vst.msk [vmem:[%s1498_s12] sm:$0x1] %vm940_vm11, %v868_v28 }
 0x1c5   : > { %vm871_vm1 = vmand %vm852_vm6, %vm869_vm15  ;;  %941 = vst.msk [vmem:[%s1503_s21] sm:$0x1] %vm940_vm11, %v939_v30 }
 0x1c6   : > { %vm872_vm2 = vmand %vm853_vm7, %vm870_vm0  ;;  %v873_v31 = vsel %vm871_vm1, inf, %v833_v2 }
 0x1c7   : > { %v874_v32 = vsel %vm872_vm2, inf, %v834_v0  ;;  %v875_v33 = vsel %vm842_vm5, %v873_v31, inf }
 0x1c8   : > { %v876_v34 = vsel %vm842_vm5, %v874_v32, inf }
 0x1c9   : > { %v877_v35 = vmin.f32 %v875_v33, %v876_v34 }
 0x1cb   : > { %v878_v36 = vrot.slane %v877_v35, 4 }
 0x1cd   : > { %v879_v37 = vmin.f32 %v877_v35, %v878_v36 }
 0x1cf   : > { %v880_v38 = vrot.slane %v879_v37, 2 }
 0x1d1   : > { %v881_v39 = vmin.f32 %v879_v37, %v880_v38 }
 0x1d3   : > { %v882_v40 = vrot.slane %v881_v39, 1 }
 0x1d5   : > { %v883_v41 = vmin.f32 %v881_v39, %v882_v40 }
 0x1d7   : > { %vm884_vm3 = vcmp.eq.f32.partialorder %v873_v31, %v883_v41  ;;  %vm885_vm4 = vcmp.eq.f32.partialorder %v874_v32, %v883_v41  ;;  %1239 = vrsqrt.f32 %v883_v41  ;;  %vm945_vm10 = vcmp.eq.f32.partialorder %v883_v41, inf }
 0x1d8   : > { %v886_v42 = vsel %vm884_vm3, %v1482_v10, 2147483647  ;;  %v887_v43 = vsel %vm885_vm4, %v1485_v13, 2147483647  ;;  %v948_v54 = vand.u32 2147483648, %v883_v41  ;;  %vm947_vm12 = vcmp.eq.f32.partialorder %v883_v41, 0.0 }
 0x1d9   : > { %v888_v44 = vsel %vm842_vm5, %v886_v42, 2147483647  ;;  %v889_v45 = vsel %vm842_vm5, %v887_v43, 2147483647 }
 0x1da   : > { %vm890_vm6 = vcmp.lt.s32.totalorder %v888_v44, %v889_v45 }
 0x1db   : > { %v891_v46 = vsel %vm890_vm6, %v888_v44, %v889_v45 }
 0x1dc   : > { %v892_v47 = vrot.slane %v891_v46, 4 }
 0x1de   : > { %vm893_vm7 = vcmp.lt.s32.totalorder %v891_v46, %v892_v47 }
 0x1df   : > { %v894_v48 = vsel %vm893_vm7, %v891_v46, %v892_v47 }
 0x1e0   : > { %v895_v49 = vrot.slane %v894_v48, 2 }
 0x1e2   : > { %vm896_vm8 = vcmp.lt.s32.totalorder %v894_v48, %v895_v49 }
 0x1e3   : > { %v897_v50 = vsel %vm896_vm8, %v894_v48, %v895_v49 }
 0x1e4   : > { %v1240_v51 = vpop.eup %1239  ;;  %v898_v52 = vrot.slane %v897_v50, 1 }
 0x1e5   : > { %v944_v53 = vmul.f32 %v1240_v51, %v883_v41 }
 0x1e6   : > { %vm899_vm9 = vcmp.lt.s32.totalorder %v897_v50, %v898_v52 }
 0x1e7   : > { %v900_v55 = vsel %vm899_vm9, %v897_v50, %v898_v52  ;;  %v946_v56 = vsel %vm945_vm10, %v883_v41, %v944_v53 }
 0x1e8   : > { %vm901_vm13 = vcmp.eq.s32.totalorder %v1482_v10, %v900_v55  ;;  %vm902_vm14 = vcmp.eq.s32.totalorder %v1485_v13, %v900_v55  ;;  %v949_v57 = vsel %vm947_vm12, %v948_v54, %v946_v56  ;;  %951 = vst.msk [vmem:[%s1498_s12 + $0x1] sm:$0x1] %vm940_vm11, %v900_v55 }
 0x1e9   : > { %vm903_vm15 = vmand %vm884_vm3, %vm901_vm13  ;;  %950 = vst.msk [vmem:[%s1503_s21 + $0x1] sm:$0x1] %vm940_vm11, %v949_v57 }
 0x1ea   : > { %vm904_vm0 = vmand %vm885_vm4, %vm902_vm14  ;;  %v905_v58 = vsel %vm903_vm15, inf, %v873_v31 }
 0x1eb   : > { %v906_v59 = vsel %vm904_vm0, inf, %v874_v32  ;;  %v907_v60 = vsel %vm842_vm5, %v905_v58, inf }
 0x1ec   : > { %v908_v61 = vsel %vm842_vm5, %v906_v59, inf }
 0x1ed   : > { %v909_v62 = vmin.f32 %v907_v60, %v908_v61 }
 0x1ef   : > { %v910_v63 = vrot.slane %v909_v62, 4 }
 0x1f1   : > { %v911_v0 = vmin.f32 %v909_v62, %v910_v63 }
 0x1f3   : > { %v912_v1 = vrot.slane %v911_v0, 2 }
 0x1f5   : > { %v913_v2 = vmin.f32 %v911_v0, %v912_v1 }
 0x1f7   : > { %v914_v3 = vrot.slane %v913_v2, 1 }
 0x1f9   : > { %v915_v4 = vmin.f32 %v913_v2, %v914_v3 }
 0x1fb   : > { %vm916_vm1 = vcmp.eq.f32.partialorder %v905_v58, %v915_v4  ;;  %vm917_vm2 = vcmp.eq.f32.partialorder %v906_v59, %v915_v4  ;;  %1241 = vrsqrt.f32 %v915_v4  ;;  %vm954_vm8 = vcmp.eq.f32.partialorder %v915_v4, inf }
 0x1fc   : > { %v918_v5 = vsel %vm916_vm1, %v1482_v10, 2147483647  ;;  %v919_v6 = vsel %vm917_vm2, %v1485_v13, 2147483647  ;;  %v957_v10 = vand.u32 2147483648, %v915_v4  ;;  %vm956_vm9 = vcmp.eq.f32.partialorder %v915_v4, 0.0 }
 0x1fd   : > { %v920_v7 = vsel %vm842_vm5, %v918_v5, 2147483647  ;;  %v921_v8 = vsel %vm842_vm5, %v919_v6, 2147483647 }
 0x1fe   : > { %vm922_vm3 = vcmp.lt.s32.totalorder %v920_v7, %v921_v8 }
 0x1ff   : > { %v923_v9 = vsel %vm922_vm3, %v920_v7, %v921_v8 }
 0x200   : > { %v924_v11 = vrot.slane %v923_v9, 4 }
 0x202   : > { %vm925_vm4 = vcmp.lt.s32.totalorder %v923_v9, %v924_v11 }
 0x203   : > { %v926_v12 = vsel %vm925_vm4, %v923_v9, %v924_v11 }
 0x204   : > { %v927_v14 = vrot.slane %v926_v12, 2 }
 0x206   : > { %vm928_vm6 = vcmp.lt.s32.totalorder %v926_v12, %v927_v14 }
 0x207   : > { %v929_v15 = vsel %vm928_vm6, %v926_v12, %v927_v14 }
 0x208   : > { %v1242_v16 = vpop.eup %1241  ;;  %v930_v17 = vrot.slane %v929_v15, 1 }
 0x209   : > { %v953_v18 = vmul.f32 %v1242_v16, %v915_v4 }
 0x20a   : > { %vm931_vm7 = vcmp.lt.s32.totalorder %v929_v15, %v930_v17 }
 0x20b   : > { %v932_v13 = vsel %vm931_vm7, %v929_v15, %v930_v17  ;;  %v955_v19 = vsel %vm954_vm8, %v915_v4, %v953_v18 }
 0x20c   : > { %v958_v20 = vsel %vm956_vm9, %v957_v10, %v955_v19  ;;  %960 = vst.msk [vmem:[%s1498_s12 + $0x2] sm:$0x1] %vm940_vm11, %v932_v13 }
 0x20d   : > { %959 = vst.msk [vmem:[%s1503_s21 + $0x2] sm:$0x1] %vm940_vm11, %v958_v20 }
 0x20e PF: > { %s20_s17 = sadd.s32 1, %s1353_s17   ;;  %s1565_s12 = smov %s1337_s13 }
 0x20f   : > { %p17_p9 = scmp.ge.s32.totalorder %s20_s17, 4   ;;  %s1566_s13 = smov %s1341_s14 }
 0x210   : > { %s1567_s14 = smov %s1426_s24  ;;  %s1568_s15 = smov %s1349_s16 }
 0x211   : > { %s1569_s16 = smov %s1571_s19  ;;  %19 = sbr.rel (!%p17_p9) target bundleno = 6 (0x6), region = 93 }
 0x216   :  { %1006 = vsyncpa [#allocation3], 1 }
 0x217   :  { %1008 = vsyncpa [#allocation3 + $0x1], 1 }
 0x218   :  { %1009 = vsyncpa [#allocation5], 1 }
 0x219   :  { %1011 = vsyncpa [#allocation5 + $0x1], 1 }

</bundles_post_ra>
